<compile_context>
chip_gen: v7x
topology: tpu7x:2x2x1
jax: 0.10.0
libtpu: 0.0.40
codegen_flags: <defaults>
</compile_context>

<pallas_src>
import functools

import jax
import jax.numpy as jnp
from jax.experimental import pallas as pl
from jax.experimental.pallas import tpu as pltpu


def _round_up(x, m):
    return ((x + m - 1) // m) * m


def critic_kernel(s_ref, a_ref, w1s_ref, w1a_ref, b1_ref, w2_ref, b2_ref, o_ref):
    # fc1: two MXU matmuls (state half + action half of W1), f32 accumulate.
    # This replaces any HBM-side concat of [s, a].
    h = jnp.dot(s_ref[...], w1s_ref[...], preferred_element_type=jnp.float32)
    h = h + jnp.dot(a_ref[...], w1a_ref[...], preferred_element_type=jnp.float32)
    # Bias + ReLU on the VPU, kept in f32 (v5e has no bf16 VPU path).
    h = jnp.maximum(h + b1_ref[...], 0.0)
    # fc2: single-column MXU matmul (cheaper than a per-row XLU lane reduce).
    q = jnp.dot(h.astype(w2_ref.dtype), w2_ref[...],
                preferred_element_type=jnp.float32)
    o_ref[...] = (q + b2_ref[0]).astype(o_ref.dtype)          # (bb, 1)


def prepare_params(w1, b1, w2, b2):
    """One-time layout/dtype conversion (call OUTSIDE the hot path).

    w1: (300, s_dim+a_dim), b1: (300,), w2: (1, 300), b2: (1,)
    Returns kernel-ready params (hidden dim zero-padded to a multiple of 128):
      w1s: (s_dim, Hp) bf16, w1a: (a_dim, Hp) bf16,
      b1p: (1, Hp) f32,      w2p: (Hp, 1) bf16,    b2p: (1,) f32
    NOTE: s_dim is inferred at call time via w1s.shape[0]; the split between
    the state and action halves of W1 is done here once.
    """
    H, K = w1.shape
    Hp = _round_up(H, 128)                                     # 300 -> 384
    w1_t = w1.T.astype(jnp.bfloat16)                           # (K, H)
    w1_pad = jnp.zeros((K, Hp), jnp.bfloat16).at[:, :H].set(w1_t)
    b1_pad = jnp.zeros((1, Hp), jnp.float32).at[:, :H].set(
        b1.astype(jnp.float32).reshape(1, H))
    w2_pad = jnp.zeros((Hp, 1), jnp.bfloat16).at[:H, :].set(
        w2.astype(jnp.bfloat16).reshape(H, 1))
    b2_p = b2.astype(jnp.float32).reshape(1)
    return w1_pad, b1_pad, w2_pad, b2_p


def critic_forward(s, a, params, *, block_b=4096):
    """s: (B, s_dim), a: (B, a_dim), params from prepare_params. Returns (B, 1) f32."""
    w1_pad, b1_p, w2_p, b2_p = params
    B, S = s.shape
    A = a.shape[1]
    Hp = w1_pad.shape[1]

    # Split W1 into its state / action halves (zero-cost slices of a prepared array).
    w1s = w1_pad[:S, :]
    w1a = w1_pad[S:S + A, :]

    # bf16 activations halve the dominant input HBM stream.  This is a no-op
    # if callers already keep s/a in bf16 (recommended); otherwise it fuses
    # into the upstream producer under jit.
    s_bf = s.astype(jnp.bfloat16)
    a_bf = a.astype(jnp.bfloat16)

    # Batch tile: large (amortizes ~0.35 us/step overhead), multiple of 32
    # (covers bf16 sublane packing), and capped so large B gives >= 2
    # "parallel" grid steps for the two v7x TensorCores.
    bb = min(block_b, _round_up(pl.cdiv(B, 2), 32))
    if bb >= B:
        bb = B                       # single block == full (small) batch
    grid = (pl.cdiv(B, bb),)         # ragged last block handled by Pallas masking

    out = pl.pallas_call(
        critic_kernel,
        out_shape=jax.ShapeDtypeStruct((B, 1), jnp.float32),
        grid=grid,
        in_specs=[
            pl.BlockSpec((bb, S), lambda i: (i, 0)),           # s tile (bf16)
            pl.BlockSpec((bb, A), lambda i: (i, 0)),           # a tile (bf16)
            pl.BlockSpec((S, Hp), lambda i: (0, 0)),           # W1 state half (resident)
            pl.BlockSpec((A, Hp), lambda i: (0, 0)),           # W1 action half (resident)
            pl.BlockSpec((1, Hp), lambda i: (0, 0)),           # b1 (resident, f32)
            pl.BlockSpec((Hp, 1), lambda i: (0, 0)),           # w2 column (resident)
            pl.BlockSpec(memory_space=pltpu.SMEM),             # b2 scalar in SMEM
        ],
        out_specs=pl.BlockSpec((bb, 1), lambda i: (i, 0)),
        compiler_params=pltpu.CompilerParams(
            dimension_semantics=("parallel",),
            vmem_limit_bytes=48 * 1024 * 1024),
    )(s_bf, a_bf, w1s, w1a, b1_p, w2_p, b2_p)

    return out


critic_forward_jit = jax.jit(functools.partial(critic_forward, block_b=4096))


def init_params(key, s_dim, a_dim, hidden=300):
    # Deterministic init mimicking nn.Linear default: U(-1/sqrt(fan_in), +).
    k1, k2, k3, k4 = jax.random.split(key, 4)
    in1 = s_dim + a_dim
    bound1 = 1.0 / jnp.sqrt(in1)
    bound2 = 1.0 / jnp.sqrt(hidden)
    w1 = jax.random.uniform(k1, (hidden, in1), jnp.float32, -bound1, bound1)
    b1 = jax.random.uniform(k2, (hidden,), jnp.float32, -bound1, bound1)
    w2 = jax.random.uniform(k3, (1, hidden), jnp.float32, -bound2, bound2)
    b2 = jax.random.uniform(k4, (1,), jnp.float32, -bound2, bound2)
    return w1, b1, w2, b2


if __name__ == "__main__":
    key = jax.random.PRNGKey(0)
    ks, ka, kp = jax.random.split(key, 3)

    B, s_dim, a_dim = 8, 24, 8
    s = jax.random.normal(ks, (B, s_dim), jnp.float32)
    a = jax.random.normal(ka, (B, a_dim), jnp.float32)
    w1, b1, w2, b2 = init_params(kp, s_dim, a_dim)

    # One-time weight layout / dtype prep (kept out of the per-step hot path).
    params = prepare_params(w1, b1, w2, b2)

    q = jax.block_until_ready(critic_forward_jit(s, a, params))

    # Pure-JAX f32 reference (same math as the PyTorch module).  Tolerance is
    # loosened because the kernel runs bf16 MXU operands with f32 accumulation.
    x = jnp.concatenate([s, a], axis=1)
    h_ref = jnp.maximum(x @ w1.T + b1, 0.0)
    q_ref = h_ref @ w2.T + b2
    assert q.shape == (B, 1)
    assert jnp.allclose(q, q_ref, atol=2e-2, rtol=2e-2), (q, q_ref)

    print("KERNEL_OK")
</pallas_src>

<mosaic_0001>
module attributes {stable_mosaic.version = 11 : i64} {
  func.func @critic_kernel(%arg0: i32, %arg1: memref<8x24xbf16, #tpu.memory_space<vmem>>, %arg2: memref<8x8xbf16, #tpu.memory_space<vmem>>, %arg3: memref<24x384xbf16, #tpu.memory_space<vmem>>, %arg4: memref<8x384xbf16, #tpu.memory_space<vmem>>, %arg5: memref<1x384xf32, #tpu.memory_space<vmem>>, %arg6: memref<384x1xbf16, #tpu.memory_space<vmem>>, %arg7: memref<1xf32, #tpu.memory_space<smem>>, %arg8: memref<8x1xf32, #tpu.memory_space<vmem>>) attributes {dimension_semantics = [#tpu.dimension_semantics<parallel>], iteration_bounds = array<i64: 1>, scalar_prefetch = 0 : i64, scratch_operands = 0 : i64, tpu.core_type = #tpu.core_type<tc>, window_params = [{transform_indices = @transform_0, window_bounds = array<i64: 8, 24>}, {transform_indices = @transform_1, window_bounds = array<i64: 8, 8>}, {pipeline_mode = #tpu.pipeline_mode<synchronous>, transform_indices = @transform_2, window_bounds = array<i64: 24, 384>}, {pipeline_mode = #tpu.pipeline_mode<synchronous>, transform_indices = @transform_3, window_bounds = array<i64: 8, 384>}, {pipeline_mode = #tpu.pipeline_mode<synchronous>, transform_indices = @transform_4, window_bounds = array<i64: 1, 384>}, {pipeline_mode = #tpu.pipeline_mode<synchronous>, transform_indices = @transform_5, window_bounds = array<i64: 384, 1>}, {transform_indices = @transform_6, window_bounds = array<i64: 1>}, {transform_indices = @transform_7, window_bounds = array<i64: 8, 1>}]} {
    %c0 = arith.constant 0 : index
    %c0_0 = arith.constant 0 : index
    %0 = vector.load %arg1[%c0, %c0_0] : memref<8x24xbf16, #tpu.memory_space<vmem>>, vector<8x24xbf16>
    %c0_1 = arith.constant 0 : index
    %c0_2 = arith.constant 0 : index
    %1 = vector.load %arg3[%c0_1, %c0_2] : memref<24x384xbf16, #tpu.memory_space<vmem>>, vector<24x384xbf16>
    %cst = arith.constant dense<0.000000e+00> : vector<8x384xf32>
    %2 = tpu.matmul %0, %1, %cst {dimension_numbers = #tpu.dot_dimension_numbers<[1], [0], [0], [1], [0, 0, 1, 1], [], []>} : vector<8x24xbf16>, vector<24x384xbf16>, vector<8x384xf32> -> vector<8x384xf32>
    %c0_3 = arith.constant 0 : index
    %c0_4 = arith.constant 0 : index
    %3 = vector.load %arg2[%c0_3, %c0_4] : memref<8x8xbf16, #tpu.memory_space<vmem>>, vector<8x8xbf16>
    %c0_5 = arith.constant 0 : index
    %c0_6 = arith.constant 0 : index
    %4 = vector.load %arg4[%c0_5, %c0_6] : memref<8x384xbf16, #tpu.memory_space<vmem>>, vector<8x384xbf16>
    %cst_7 = arith.constant dense<0.000000e+00> : vector<8x384xf32>
    %5 = tpu.matmul %3, %4, %cst_7 {dimension_numbers = #tpu.dot_dimension_numbers<[1], [0], [0], [1], [0, 0, 1, 1], [], []>} : vector<8x8xbf16>, vector<8x384xbf16>, vector<8x384xf32> -> vector<8x384xf32>
    %6 = arith.addf %2, %5 : vector<8x384xf32>
    %c0_8 = arith.constant 0 : index
    %c0_9 = arith.constant 0 : index
    %7 = vector.load %arg5[%c0_8, %c0_9] : memref<1x384xf32, #tpu.memory_space<vmem>>, vector<1x384xf32>
    %8 = vector.broadcast %7 : vector<1x384xf32> to vector<8x384xf32>
    %9 = arith.addf %6, %8 : vector<8x384xf32>
    %cst_10 = arith.constant 0.000000e+00 : f32
    %10 = vector.broadcast %cst_10 : f32 to vector<8x384xf32>
    %11 = arith.maximumf %9, %10 : vector<8x384xf32>
    %12 = arith.truncf %11 : vector<8x384xf32> to vector<8x384xbf16>
    %c0_11 = arith.constant 0 : index
    %c0_12 = arith.constant 0 : index
    %13 = vector.load %arg6[%c0_11, %c0_12] : memref<384x1xbf16, #tpu.memory_space<vmem>>, vector<384x1xbf16>
    %cst_13 = arith.constant dense<0.000000e+00> : vector<8x1xf32>
    %14 = tpu.matmul %12, %13, %cst_13 {dimension_numbers = #tpu.dot_dimension_numbers<[1], [0], [0], [1], [0, 0, 1, 1], [], []>} : vector<8x384xbf16>, vector<384x1xbf16>, vector<8x1xf32> -> vector<8x1xf32>
    %c0_14 = arith.constant 0 : index
    %15 = memref.load %arg7[%c0_14] : memref<1xf32, #tpu.memory_space<smem>>
    %16 = vector.broadcast %15 : f32 to vector<8x1xf32>
    %17 = arith.addf %14, %16 : vector<8x1xf32>
    %c0_15 = arith.constant 0 : index
    %c0_16 = arith.constant 0 : index
    %18 = vector.load %arg8[%c0_15, %c0_16] : memref<8x1xf32, #tpu.memory_space<vmem>>, vector<8x1xf32>
    tpu.vector_store %arg8[%c0_15, %c0_16], %17 {strides = array<i32>} : memref<8x1xf32, #tpu.memory_space<vmem>>, vector<8x1xf32>,
    return
  }
  func.func @transform_0(%arg0: i32) -> (i32, i32) {
    %c0_i32 = arith.constant 0 : i32
    %c0_i32_0 = arith.constant 0 : i32
    return %arg0, %c0_i32 : i32, i32
  }
  func.func @transform_1(%arg0: i32) -> (i32, i32) {
    %c0_i32 = arith.constant 0 : i32
    %c0_i32_0 = arith.constant 0 : i32
    return %arg0, %c0_i32 : i32, i32
  }
  func.func @transform_2(%arg0: i32) -> (i32, i32) {
    %c0_i32 = arith.constant 0 : i32
    %c0_i32_0 = arith.constant 0 : i32
    %c0_i32_1 = arith.constant 0 : i32
    return %c0_i32, %c0_i32_0 : i32, i32
  }
  func.func @transform_3(%arg0: i32) -> (i32, i32) {
    %c0_i32 = arith.constant 0 : i32
    %c0_i32_0 = arith.constant 0 : i32
    %c0_i32_1 = arith.constant 0 : i32
    return %c0_i32, %c0_i32_0 : i32, i32
  }
  func.func @transform_4(%arg0: i32) -> (i32, i32) {
    %c0_i32 = arith.constant 0 : i32
    %c0_i32_0 = arith.constant 0 : i32
    %c0_i32_1 = arith.constant 0 : i32
    return %c0_i32, %c0_i32_0 : i32, i32
  }
  func.func @transform_5(%arg0: i32) -> (i32, i32) {
    %c0_i32 = arith.constant 0 : i32
    %c0_i32_0 = arith.constant 0 : i32
    %c0_i32_1 = arith.constant 0 : i32
    return %c0_i32, %c0_i32_0 : i32, i32
  }
  func.func @transform_6(%arg0: i32) -> i32 {
    %c0_i32 = arith.constant 0 : i32
    %c0_i32_0 = arith.constant 0 : i32
    return %c0_i32 : i32
  }
  func.func @transform_7(%arg0: i32) -> (i32, i32) {
    %c0_i32 = arith.constant 0 : i32
    %c0_i32_0 = arith.constant 0 : i32
    return %arg0, %c0_i32 : i32, i32
  }
}

</mosaic_0001>

<bundles_post_ra>
// kernel: critic_forward.1
= control target key start
LH: loop header
LB: loop body
LE: loop exit
PB: predicated region body
PF: predicated region fallthrough
CT: control target
= control target key end

     0   :  { %vm50_vm0 = vcmask 1043456   ;;  %v711_v1 = vmov 0.0   ;;  %v712_v3 = vmov 0   ;;  %vm713_vm1 = vmmov 0   ;;  %s885_s3 = inlined_call_operand.vmem [shape: bf16[8,384], index: 3, kind: input, shape index: {}]   ;;  %s886_s1 = inlined_call_operand.vmem [shape: bf16[8,8], index: 1, kind: input, shape index: {}]   ;;  %s887_s2 = inlined_call_operand.vmem [shape: bf16[24,384], index: 2, kind: input, shape index: {}]   ;;  %s888_s5 = inlined_call_operand.vmem [shape: bf16[384,1], index: 5, kind: input, shape index: {}]   ;;  %s889_s0 = inlined_call_operand.vmem [shape: bf16[8,24], index: 0, kind: input, shape index: {}]   ;;  %s890_s4 = inlined_call_operand.vmem [shape: f32[1,384], index: 4, kind: input, shape index: {}]   ;;  %s891_s6 = inlined_call_operand.<no memory space> [shape: f32[1], index: 6, kind: input, shape index: {}]   ;;  %s892_s7 = inlined_call_operand.vmem [shape: f32[8,1], index: 7, kind: output, shape index: {}]  }
   0x1   :  { %v36_v0 = vld [vmem:[%s885_s3] sm:$0xff]  ;;  %640 = vmatprep.subr.bf16.mxu1 %v711_v1  ;;  %v679_v2 = vld [vmem:[%s885_s3 + $0x8] ss:$0 sps:$4 sm:$0xff]   ;;  %92 = vmatprep.mubr.bf16.mxu0 %v712_v3  ;;  %v33_v10 = vld [vmem:[%s887_s2 + $0x18] sm:$0xff]  ;;  %vm46_vm2 = vcmask 64512   ;;  %vm165_vm3 = vcmask 195584   ;;  %v261_v43 = vlaneseq }
   0x2   :  { %v566_v4 = vcombine.high %v36_v0, %v36_v0  ;;  %v565_v5 = vcombine.low %v36_v0, %v36_v0  ;;  %642 = vmatprep.mubr.msk.bf16.mxu1 %vm713_vm1, %v711_v1  ;;  %v35_v6 = vld [vmem:[%s886_s1] sm:$0xf]  ;;  %v58_v7 = vsel %vm50_vm0, %v679_v2, 0  ;;  %v682_v9 = vld [vmem:[%s887_s2 + $0x4] ss:$12 sps:$4 sm:$0xff]   ;;  %v575_v14 = vcombine.high %v33_v10, %v33_v10  ;;  %v690_v22 = vld [vmem:[%s888_s5 + $0x88] sm:$0xff]  }
   0x3   :  { %v680_v8 = vld [vmem:[%s887_s2] ss:$12 sps:$4 sm:$0xff]   ;;  %641 = vmatpush3.bf16.msra.mxu1 %v58_v7  ;;  %v683_v12 = vld [vmem:[%s887_s2 + $0x8] ss:$12 sps:$4 sm:$0xff]   ;;  %v574_v15 = vcombine.low %v33_v10, %v33_v10  ;;  %v697_v28 = vld [vmem:[%s888_s5 + $0x58] sm:$0xff]   ;;  %v262_v44 = vshrl.u32 %v261_v43, 7 }
   0x4   :  { %568 = vmatprep.subr.msk.bf16.mxu0 %vm50_vm0, %v566_v4  ;;  %v52_v11 = vsel %vm50_vm0, %v565_v5, 0  ;;  %646 = vmatprep.subr.bf16.mxu1 %v711_v1  ;;  %v686_v13 = vld [vmem:[%s887_s2 + $0x20] ss:$0 sps:$4 sm:$0xff]   ;;  %v691_v23 = vld [vmem:[%s888_s5 + $0x48] sm:$0xff]   ;;  %v694_v25 = vld [vmem:[%s888_s5 + $0x50] sm:$0xff]   ;;  %vm559_vm4 = vcmask 7168  }
   0x5   :  { %61 = vmatpush1.bf16.msra.mxu0 %v52_v11  ;;  %v176_v16 = vsel %vm50_vm0, %v686_v13, 0  ;;  %v170_v17 = vsel %vm50_vm0, %v574_v15, 0  ;;  %v688_v18 = vld [vmem:[%s888_s5 + $0x40] sm:$0xff]   ;;  %v692_v24 = vld [vmem:[%s888_s5 + $0x8] sm:$0xff]   ;;  %v693_v26 = vld [vmem:[%s888_s5 + $0x90] sm:$0xff]   ;;  %v271_v52 = vsub.s32 2, %v262_v44 }
   0x6   :  { %178 = vmatprep.subr.bf16.mxu0 %v682_v9  ;;  %643 = vmatmul.mubr.msk.bf16.vlgmr.msra.gmra.mrb[0].mxu1 %vm46_vm2, %v35_v6  ;;  %v687_v19 = vld [vmem:[%s888_s5 + $0x80] sm:$0xff]   ;;  %v695_v27 = vld [vmem:[%s888_s5 + $0x10] sm:$0xff]   ;;  %v696_v29 = vld [vmem:[%s888_s5 + $0x98] sm:$0xff]   ;;  %v263_v55 = vsub.s32 0, %v262_v44  ;;  %v267_v56 = vsub.s32 1, %v262_v44 }
   0x7   :  { %647 = vmatpush3.bf16.msra.mxu1 %v683_v12  ;;  %650 = vmatprep.mubr.msk.bf16.mxu1 %vm713_vm1, %v711_v1  ;;  %v28_v20 = vld [vmem:[%s889_s0] sm:$0xf]  ;;  %v698_v30 = vld [vmem:[%s888_s5 + $0x18] sm:$0xff]   ;;  %v702_v34 = vld [vmem:[%s888_s5 + $0xa8] sm:$0xff]  }
   0x8   :  { %569 = vmatmul.mubr.msk.bf16.vlgmr.msra.gmra.mrb[0].mxu0 %vm46_vm2, %v35_v6  ;;  %648 = vmatprep.subr.bf16.mxu1 %v711_v1  ;;  %v689_v21 = vld [vmem:[%s888_s5] sm:$0xff]   ;;  %v703_v35 = vld [vmem:[%s888_s5 + $0x68] sm:$0xff]   ;;  %v705_v37 = vld [vmem:[%s888_s5 + $0xb0] sm:$0xff]  }
   0x9   :  { %179 = vmatpush1.bf16.msra.mxu0 %v680_v8  ;;  %210 = vmatprep.mubr.bf16.mxu0 %v712_v3  ;;  %v699_v31 = vld [vmem:[%s888_s5 + $0xa0] sm:$0xff]   ;;  %v704_v36 = vld [vmem:[%s888_s5 + $0x28] sm:$0xff]   ;;  %v706_v38 = vld [vmem:[%s888_s5 + $0x70] sm:$0xff]  }
   0xa   :  { %577 = vmatprep.subr.msk.bf16.mxu0 %vm50_vm0, %v575_v14  ;;  %v700_v32 = vld [vmem:[%s888_s5 + $0x60] sm:$0xff]   ;;  %v707_v39 = vld [vmem:[%s888_s5 + $0x30] sm:$0xff]   ;;  %v708_v40 = vld [vmem:[%s888_s5 + $0xb8] sm:$0xff]  }
   0xb   :  { %649 = vmatpush3.bf16.msra.mxu1 %v176_v16  ;;  %v701_v33 = vld [vmem:[%s888_s5 + $0x20] sm:$0xff]   ;;  %v709_v41 = vld [vmem:[%s888_s5 + $0x78] sm:$0xff]  }
   0xc   :  { %654 = vmatprep.subr.bf16.mxu1 %v711_v1  ;;  %v710_v42 = vld [vmem:[%s888_s5 + $0x38] sm:$0xff]   ;;  %v259_v54 = vld [vmem:[%s890_s4] sm:$0x7] }
   0xd   :  { %181 = vmatpush1.bf16.msra.mxu0 %v170_v17  ;;  %v272_v57 = vrot.slane %v259_v54, %v271_v52  ;;  %v264_v58 = vrot.slane %v259_v54, %v263_v55  ;;  %v268_v62 = vrot.slane %v259_v54, %v267_v56 }
   0xe   :  { %609 = vmatprep.subr.bf16.mxu0 %v688_v18  ;;  %651 = vmatmul.mubr.msk.bf16.vlgmr.msra.gmra.mrb[4].mxu1 %vm165_vm3, %v28_v20 }
   0xf   :  { %655 = vmatpush3.bf16.msra.mxu1 %v687_v19  ;;  %670 = vmatprep.mubr.msk.bf16.mxu1 %vm713_vm1, %v711_v1 }
  0x10   :  { %578 = vmatmul.mubr.msk.bf16.vlgmr.msra.gmra.mrb[4].mxu0 %vm165_vm3, %v28_v20  ;;  %656 = vmatprep.subr.bf16.mxu1 %v711_v1 }
  0x11   :  { %610 = vmatpush3.bf16.msra.mxu0 %v689_v21  ;;  %v334_v21 = vstv %s891_s6 }
  0x12   :  { %611 = vmatprep.subr.bf16.mxu0 %v691_v23 }
  0x13   :  { %657 = vmatpush3.bf16.msra.mxu1 %v690_v22 }
  0x14   :  { %658 = vmatprep.subr.bf16.mxu1 %v711_v1 }
  0x15   :  { %612 = vmatpush3.bf16.msra.mxu0 %v692_v24 }
  0x16   :  { %613 = vmatprep.subr.bf16.mxu0 %v694_v25 }
  0x17   :  { %659 = vmatpush3.bf16.msra.mxu1 %v693_v26 }
  0x18   :  { %660 = vmatprep.subr.bf16.mxu1 %v711_v1 }
  0x19   :  { %614 = vmatpush3.bf16.msra.mxu0 %v695_v27 }
  0x1a   :  { %615 = vmatprep.subr.bf16.mxu0 %v697_v28 }
  0x1b   :  { %661 = vmatpush3.bf16.msra.mxu1 %v696_v29 }
  0x1c   :  { %662 = vmatprep.subr.bf16.mxu1 %v711_v1 }
  0x1d   :  { %616 = vmatpush3.bf16.msra.mxu0 %v698_v30 }
  0x1e   :  { %617 = vmatprep.subr.bf16.mxu0 %v700_v32 }
  0x1f   :  { %663 = vmatpush3.bf16.msra.mxu1 %v699_v31 }
  0x20   :  { %664 = vmatprep.subr.bf16.mxu1 %v711_v1 }
  0x21   :  { %618 = vmatpush3.bf16.msra.mxu0 %v701_v33 }
  0x22   :  { %619 = vmatprep.subr.bf16.mxu0 %v703_v35 }
  0x23   :  { %665 = vmatpush3.bf16.msra.mxu1 %v702_v34 }
  0x24   :  { %666 = vmatprep.subr.bf16.mxu1 %v711_v1 }
  0x25   :  { %620 = vmatpush3.bf16.msra.mxu0 %v704_v36 }
  0x26   :  { %621 = vmatprep.subr.bf16.mxu0 %v706_v38 }
  0x27   :  { %667 = vmatpush3.bf16.msra.mxu1 %v705_v37 }
  0x28   :  { %668 = vmatprep.subr.bf16.mxu1 %v711_v1 }
  0x29   :  { %622 = vmatpush3.bf16.msra.mxu0 %v707_v39 }
  0x2a   :  { %623 = vmatprep.subr.bf16.mxu0 %v709_v41 }
  0x2b   :  { %669 = vmatpush3.bf16.msra.mxu1 %v708_v40 }
  0x2d   :  { %624 = vmatpush3.bf16.msra.mxu0 %v710_v42 }
  0xd9   :  { %v135_v45 = vpop.f32.mrb[0].mxu1 }
  0xda   :  { %v644_v47 = vpop.f32.mrb[1].mxu1 }
  0xdb   :  { %v94_v46 = vpop.f32.mrb[0].mxu0  ;;  %v138_v49 = vpop.f32.mrb[2].mxu1 }
  0xdc   :  { %v96_v48 = vpop.f32.mrb[1].mxu0  ;;  %v645_v51 = vpop.f32.mrb[3].mxu1 }
  0xdd   :  { %v98_v50 = vpop.f32.mrb[2].mxu0 }
  0xde   :  { %v99_v53 = vpop.f32.mrb[3].mxu0 }
  0xe1   :  { %v253_v59 = vpop.f32.mrb[4].mxu1 }
  0xe2   :  { %v254_v61 = vadd.f32 %v253_v59, %v135_v45  ;;  %v652_v63 = vpop.f32.mrb[5].mxu1 }
  0xe3   :  { %v212_v60 = vpop.f32.mrb[4].mxu0  ;;  %v256_v2 = vpop.f32.mrb[6].mxu1 }
  0xe4   :  { %v213_v0 = vadd.f32 %v212_v60, %v94_v46  ;;  %v214_v1 = vpop.f32.mrb[5].mxu0  ;;  %v278_v3 = vadd.f32 %v272_v57, %v254_v61  ;;  %v653_v6 = vpop.f32.mrb[7].mxu1 }
  0xe5   :  { %v215_v4 = vadd.f32 %v214_v1, %v96_v48  ;;  %v216_v5 = vpop.f32.mrb[6].mxu0 }
  0xe6   :  { %v276_v7 = vadd.f32 %v264_v58, %v213_v0  ;;  %v217_v8 = vpop.f32.mrb[7].mxu0  ;;  %v281_v9 = vmax.f32 %v278_v3, 0.0 }
  0xe7   :  { %v277_v10 = vadd.f32 %v268_v62, %v215_v4 }
  0xe8   :  { %v279_v11 = vmax.f32 %v276_v7, 0.0  ;;  %v284_v12 = vpack.c.bf16 %v281_v9, %v281_v9 }
  0xe9   :  { %v280_v13 = vmax.f32 %v277_v10, 0.0 }
  0xea   :  { %671 = vmatmul.mubr.bf16.vlgmr.msra.gmra.mrb[8].mxu1 %v284_v12  ;;  %v282_v15 = vpack.c.bf16 %v279_v11, %v279_v11 }
  0xeb   :  { %v283_v14 = vpack.c.bf16 %v280_v13, %v280_v13 }
  0xed   :  { %511 = vmatprep.mubr.bf16.mxu0 %v283_v14 }
  0xee   :  { %512 = vmatmul.mubr.bf16.vlgmr.msra.gmra.mrb[8].mxu0 %v282_v15 }
 0x1bd   :  { %v553_v16 = vpop.f32.mrb[8].mxu1 }
 0x1be   :  { %v672_v17 = vpop.f32.mrb[9].mxu1 }
 0x1bf   :  { %v556_v18 = vpop.f32.mrb[10].mxu1 }
 0x1c0   :  { %v673_v20 = vpop.f32.mrb[11].mxu1 }
 0x1c1   :  { %v625_v19 = vpop.f32.mrb[8].mxu0 }
 0x1c2   :  { %v626_v22 = vpop.f32.mrb[9].mxu0 }
 0x1c3   :  { %v627_v23 = vadd.f32 %v626_v22, %v625_v19  ;;  %v628_v24 = vpop.f32.mrb[10].mxu0 }
 0x1c4   :  { %v629_v25 = vpop.f32.mrb[11].mxu0 }
 0x1c5   :  { %v514_v26 = vadd.f32 %v627_v23, %v334_v21 }
 0x1c7   :  { %v554_v27 = vadd.f32 %v553_v16, %v514_v26 }
 0x1c9   :  { %560 = vst.msk [vmem:[%s892_s7] sm:$0xff] %vm559_vm4, %v554_v27 }

</bundles_post_ra>
